<compile_context>
chip_gen: v5e
topology: v5e:2x2
jax: 0.10.0
libtpu: 0.0.40
codegen_flags: <defaults>
</compile_context>

<pallas_src>
import jax
import jax.numpy as jnp
from jax.experimental import pallas as pl
from jax.experimental.pallas import tpu as pltpu

STATE_DIM = 6    # HIVPatient observation_space.shape[0]
HIDDEN = 128
OUT_DIM = 1


def _round_up(n: int, m: int) -> int:
    return ((n + m - 1) // m) * m


def _num_tensorcores() -> int:
    # v7x has 2 TensorCores per chip; keep >=2 grid steps there so the "parallel" batch axis
    # can actually shard across both TCs.  v5e/v6e (1 TC) prefer a single big block.
    try:
        kind = jax.devices()[0].device_kind.lower()
        return 2 if "v7" in kind else 1
    except Exception:
        return 1


def _value_net_kernel(xt_ref, w1t_ref, b1_ref, w2_ref, b2_ref, o_ref):
    # fc1: (128, 6) @ (6, TB) on the MXU (bf16 operands, f32 accumulate),
    # bias + ReLU in f32 on the VPU.  Batch stays on the lane axis throughout.
    h = jnp.dot(w1t_ref[...], xt_ref[...], preferred_element_type=jnp.float32)
    h = jnp.maximum(h + b1_ref[...], 0.0)                       # (HIDDEN, TB) f32
    # fc2: full-K (1, 128) @ (128, TB) MXU contraction.  The result is already the lane-dense
    # (1, TB) block the out_spec expects -> unmasked vst, no reshuffle.
    o_ref[...] = (
        jnp.dot(w2_ref[...], h.astype(jnp.bfloat16),
                preferred_element_type=jnp.float32)
        + b2_ref[...]
    )


def value_network_forward(x, w1, b1, w2, b2, *, block_b=8192):
    """Pallas forward pass of valueNetwork.

    x:  (B, state_dim) or (state_dim,)  -- any float dtype (cast like .to(torch.float32))
    w1: (state_dim, 128), b1: (128,)    -- weights stored [in, out] (transposed vs torch [out, in])
    w2: (128, 1),         b2: (1,)
    returns: (B, 1) float32
    """
    if x.ndim == 1:                                             # mirrors x.unsqueeze(dim=0)
        x = x[None, :]
    B = x.shape[0]

    # Batch tile: lane-dense (multiple of 128), capped by block_b, and split so v7x gets >=2
    # grid steps when the batch is large enough to matter.
    block_b = max(128, _round_up(block_b, 128))
    tb_full = _round_up(B, 128)
    tb = min(block_b, max(128, _round_up(pl.cdiv(tb_full, _num_tensorcores()), 128)))
    b_pad = _round_up(B, tb)
    num_blocks = b_pad // tb

    # Transposed, lane-dense x layout: (STATE_DIM, B_pad), bf16 MXU operand.
    xt = jnp.transpose(x.astype(jnp.float32)).astype(jnp.bfloat16)
    if b_pad != B:
        xt = jnp.pad(xt, ((0, 0), (0, b_pad - B)))

    out = pl.pallas_call(
        _value_net_kernel,
        out_shape=jax.ShapeDtypeStruct((1, b_pad), jnp.float32),
        grid_spec=pl.GridSpec(
            grid=(num_blocks,),
            in_specs=[
                # x streams one (6, TB) tile per grid step (double-buffered DMA); ~16x less
                # VMEM than the old row-major (TB, 6) tile (no 6->128 lane padding).
                pl.BlockSpec((STATE_DIM, tb), lambda i: (0, i)),
                # Weights / biases: constant index_map -> VMEM-resident, no re-DMA per step.
                pl.BlockSpec((HIDDEN, STATE_DIM), lambda i: (0, 0)),
                pl.BlockSpec((HIDDEN, 1), lambda i: (0, 0)),
                pl.BlockSpec((1, HIDDEN), lambda i: (0, 0)),
                pl.BlockSpec((1, OUT_DIM), lambda i: (0, 0)),
            ],
            # Lane-dense output slab: (1, B_pad), one (1, TB) block per grid step.
            out_specs=pl.BlockSpec((1, tb), lambda i: (0, i)),
        ),
        compiler_params=pltpu.CompilerParams(
            # Batch tiles are independent -> shard grid steps across both TCs on v7x.
            dimension_semantics=("parallel",),
        ),
    )(
        xt,
        jnp.transpose(w1.astype(jnp.float32)).astype(jnp.bfloat16),   # (128, 6) bf16
        b1.reshape(HIDDEN, 1).astype(jnp.float32),                    # (128, 1) f32 column
        w2.reshape(1, HIDDEN).astype(jnp.bfloat16),                   # (1, 128) bf16 row
        b2.reshape(1, OUT_DIM).astype(jnp.float32),                   # (1, 1) f32
    )

    # (1, B_pad) lane-dense slab -> (B, 1).  Padded columns (zero inputs) contain
    # w2·relu(b1)+b2 garbage and MUST be discarded by this slice.
    return out.reshape(b_pad, 1)[:B]


def init_params(key):
    """Deterministic parameter init matching nn.Linear shapes (uniform, kaiming-style bounds)."""
    k1, k2, k3, k4 = jax.random.split(key, 4)
    bound1 = 1.0 / jnp.sqrt(STATE_DIM)
    bound2 = 1.0 / jnp.sqrt(HIDDEN)
    # stored as [in, out] (transposed vs. PyTorch's [out, in]) so references compute x @ W
    w1 = jax.random.uniform(k1, (STATE_DIM, HIDDEN), jnp.float32, -bound1, bound1)
    b1 = jax.random.uniform(k2, (HIDDEN,), jnp.float32, -bound1, bound1)
    w2 = jax.random.uniform(k3, (HIDDEN, OUT_DIM), jnp.float32, -bound2, bound2)
    b2 = jax.random.uniform(k4, (OUT_DIM,), jnp.float32, -bound2, bound2)
    return w1, b1, w2, b2


if __name__ == "__main__":
    key = jax.random.PRNGKey(0)
    kx, kp = jax.random.split(key)
    w1, b1, w2, b2 = init_params(kp)

    def reference(x):
        if x.ndim == 1:
            x = x[None, :]
        h = jnp.maximum(jnp.dot(x.astype(jnp.float32), w1) + b1, 0.0)
        return jnp.dot(h, w2) + b2

    # Tolerance absorbs the bf16 MXU operand cast (f32 accumulate); measured error is ~5e-3,
    # structural bugs would be orders of magnitude larger.
    TOL = dict(atol=2e-2, rtol=2e-2)

    # small batch of HIV states
    B = 8
    x = jax.random.normal(kx, (B, STATE_DIM), dtype=jnp.float32)
    out = jax.block_until_ready(value_network_forward(x, w1, b1, w2, b2))
    assert out.shape == (B, OUT_DIM)
    assert jnp.allclose(out, reference(x), **TOL)

    # 1-D input path (x.dim() == 1 -> unsqueeze), padded to one tile inside the wrapper
    out1 = jax.block_until_ready(value_network_forward(x[0], w1, b1, w2, b2))
    assert out1.shape == (1, OUT_DIM)
    assert jnp.allclose(out1, reference(x[0]), **TOL)

    # multi-block path: B not divisible by the tile -> several grid steps + padded tail
    B2 = 300
    x2 = jax.random.normal(jax.random.PRNGKey(1), (B2, STATE_DIM), dtype=jnp.float32)
    out2 = jax.block_until_ready(value_network_forward(x2, w1, b1, w2, b2, block_b=128))
    assert out2.shape == (B2, OUT_DIM)
    assert jnp.allclose(out2, reference(x2), **TOL)

    print("KERNEL_OK")
</pallas_src>

<mosaic_0001>
module attributes {stable_mosaic.version = 11 : i64} {
  func.func @_value_net_kernel(%arg0: i32, %arg1: memref<6x128xbf16, #tpu.memory_space<vmem>>, %arg2: memref<128x6xbf16, #tpu.memory_space<vmem>>, %arg3: memref<128x1xf32, #tpu.memory_space<vmem>>, %arg4: memref<1x128xbf16, #tpu.memory_space<vmem>>, %arg5: memref<1x1xf32, #tpu.memory_space<vmem>>, %arg6: memref<1x128xf32, #tpu.memory_space<vmem>>) attributes {dimension_semantics = [#tpu.dimension_semantics<parallel>], iteration_bounds = array<i64: 1>, scalar_prefetch = 0 : i64, scratch_operands = 0 : i64, tpu.core_type = #tpu.core_type<tc>, window_params = [{transform_indices = @transform_0, window_bounds = array<i64: 6, 128>}, {pipeline_mode = #tpu.pipeline_mode<synchronous>, transform_indices = @transform_1, window_bounds = array<i64: 128, 6>}, {pipeline_mode = #tpu.pipeline_mode<synchronous>, transform_indices = @transform_2, window_bounds = array<i64: 128, 1>}, {pipeline_mode = #tpu.pipeline_mode<synchronous>, transform_indices = @transform_3, window_bounds = array<i64: 1, 128>}, {pipeline_mode = #tpu.pipeline_mode<synchronous>, transform_indices = @transform_4, window_bounds = array<i64: 1, 1>}, {transform_indices = @transform_5, window_bounds = array<i64: 1, 128>}]} {
    %c0 = arith.constant 0 : index
    %c0_0 = arith.constant 0 : index
    %0 = vector.load %arg2[%c0, %c0_0] : memref<128x6xbf16, #tpu.memory_space<vmem>>, vector<128x6xbf16>
    %c0_1 = arith.constant 0 : index
    %c0_2 = arith.constant 0 : index
    %1 = vector.load %arg1[%c0_1, %c0_2] : memref<6x128xbf16, #tpu.memory_space<vmem>>, vector<6x128xbf16>
    %cst = arith.constant dense<0.000000e+00> : vector<128x128xf32>
    %2 = tpu.matmul %0, %1, %cst {dimension_numbers = #tpu.dot_dimension_numbers<[1], [0], [0], [1], [0, 0, 1, 1], [], []>} : vector<128x6xbf16>, vector<6x128xbf16>, vector<128x128xf32> -> vector<128x128xf32>
    %c0_3 = arith.constant 0 : index
    %c0_4 = arith.constant 0 : index
    %3 = vector.load %arg3[%c0_3, %c0_4] : memref<128x1xf32, #tpu.memory_space<vmem>>, vector<128x1xf32>
    %4 = vector.broadcast %3 : vector<128x1xf32> to vector<128x128xf32>
    %5 = arith.addf %2, %4 : vector<128x128xf32>
    %cst_5 = arith.constant 0.000000e+00 : f32
    %6 = vector.broadcast %cst_5 : f32 to vector<128x128xf32>
    %7 = arith.maximumf %5, %6 : vector<128x128xf32>
    %c0_6 = arith.constant 0 : index
    %c0_7 = arith.constant 0 : index
    %8 = vector.load %arg4[%c0_6, %c0_7] : memref<1x128xbf16, #tpu.memory_space<vmem>>, vector<1x128xbf16>
    %9 = arith.truncf %7 : vector<128x128xf32> to vector<128x128xbf16>
    %cst_8 = arith.constant dense<0.000000e+00> : vector<1x128xf32>
    %10 = tpu.matmul %8, %9, %cst_8 {dimension_numbers = #tpu.dot_dimension_numbers<[1], [0], [0], [1], [0, 0, 1, 1], [], []>} : vector<1x128xbf16>, vector<128x128xbf16>, vector<1x128xf32> -> vector<1x128xf32>
    %c0_9 = arith.constant 0 : index
    %c0_10 = arith.constant 0 : index
    %11 = vector.load %arg5[%c0_9, %c0_10] : memref<1x1xf32, #tpu.memory_space<vmem>>, vector<1x1xf32>
    %12 = vector.broadcast %11 : vector<1x1xf32> to vector<1x128xf32>
    %13 = arith.addf %10, %12 : vector<1x128xf32>
    %c0_11 = arith.constant 0 : index
    %c0_12 = arith.constant 0 : index
    %14 = vector.load %arg6[%c0_11, %c0_12] : memref<1x128xf32, #tpu.memory_space<vmem>>, vector<1x128xf32>
    tpu.vector_store %arg6[%c0_11, %c0_12], %13 {strides = array<i32>} : memref<1x128xf32, #tpu.memory_space<vmem>>, vector<1x128xf32>,
    return
  }
  func.func @transform_0(%arg0: i32) -> (i32, i32) {
    %c0_i32 = arith.constant 0 : i32
    %c0_i32_0 = arith.constant 0 : i32
    return %c0_i32, %arg0 : i32, i32
  }
  func.func @transform_1(%arg0: i32) -> (i32, i32) {
    %c0_i32 = arith.constant 0 : i32
    %c0_i32_0 = arith.constant 0 : i32
    %c0_i32_1 = arith.constant 0 : i32
    return %c0_i32, %c0_i32_0 : i32, i32
  }
  func.func @transform_2(%arg0: i32) -> (i32, i32) {
    %c0_i32 = arith.constant 0 : i32
    %c0_i32_0 = arith.constant 0 : i32
    %c0_i32_1 = arith.constant 0 : i32
    return %c0_i32, %c0_i32_0 : i32, i32
  }
  func.func @transform_3(%arg0: i32) -> (i32, i32) {
    %c0_i32 = arith.constant 0 : i32
    %c0_i32_0 = arith.constant 0 : i32
    %c0_i32_1 = arith.constant 0 : i32
    return %c0_i32, %c0_i32_0 : i32, i32
  }
  func.func @transform_4(%arg0: i32) -> (i32, i32) {
    %c0_i32 = arith.constant 0 : i32
    %c0_i32_0 = arith.constant 0 : i32
    %c0_i32_1 = arith.constant 0 : i32
    return %c0_i32, %c0_i32_0 : i32, i32
  }
  func.func @transform_5(%arg0: i32) -> (i32, i32) {
    %c0_i32 = arith.constant 0 : i32
    %c0_i32_0 = arith.constant 0 : i32
    return %c0_i32, %arg0 : i32, i32
  }
}

</mosaic_0001>

<bundles_post_ra>
// kernel: tpu_custom_call.1
= control target key start
LH: loop header
LB: loop body
LE: loop exit
PB: predicated region body
PF: predicated region fallthrough
CT: control target
= control target key end

     0   :  { %s528_s0 = inlined_call_operand.vmem [shape: bf16[6,128], index: 0, kind: input, shape index: {}]   ;;  %s529_s1 = inlined_call_operand.vmem [shape: bf16[128,6], index: 1, kind: input, shape index: {}]   ;;  %s530_s2 = inlined_call_operand.vmem [shape: f32[128,1], index: 2, kind: input, shape index: {}]   ;;  %s531_s3 = inlined_call_operand.vmem [shape: bf16[1,128], index: 3, kind: input, shape index: {}]   ;;  %s532_s4 = inlined_call_operand.<no memory space> [shape: f32[1,1], index: 4, kind: input, shape index: {}]   ;;  %s533_s5 = inlined_call_operand.hbm [shape: f32[1,128], index: 5, kind: output, shape index: {}]  }
   0x1   :  { %v10_v0 = vstv %s532_s4 }
   0x2   :  { %11 = vst [vmem:[#allocation2] sm:$0x1] %v10_v0 }
   0x3   :  { %v55_v1 = vld [vmem:[%s530_s2 + $0x70] sm:$0xff]  ;;  %v40_v2 = vld [vmem:[%s528_s0] sm:$0x7]  ;;  %vm202_vm0 = vcmask 1042432   ;;  %v398_v3 = vmov 0   ;;  %vm177_vm1 = vcmask 48128  }
   0x4   :  { %369 = vset.pattern.permute.xlu0 %v398_v3  ;;  %v204_v4 = vsel %vm202_vm0, %v40_v2, 0  ;;  %370 = vset.pattern.permute.xlu1 %v398_v3  ;;  %v357_v5 = vld [vmem:[%s529_s1] sm:$0xff]  ;;  %v360_v7 = vld [vmem:[%s529_s1 + $0x18] sm:$0xff]  ;;  %v363_v8 = vld [vmem:[%s529_s1 + $0x30] sm:$0xff] }
   0x5   :  { %v53_v6 = vld [vmem:[%s530_s2 + $0x60] sm:$0xff]  ;;  %129 = vperm.xlu0 %369, %v55_v1   ;;  %213 = vmatpush.bf16.msra.mxu0 %v204_v4  ;;  %v51_v9 = vld [vmem:[%s530_s2 + $0x50] sm:$0xff]  ;;  %v56_v10 = vld [vmem:[%s530_s2 + $0x78] sm:$0xff] }
   0x6   :  { %365 = vmatpush.bf16.msra.mxu2 %v204_v4  ;;  %366 = vmatpush.bf16.msra.mxu3 %v204_v4 }
   0x7   :  { %119 = vperm.xlu1 %370, %v53_v6   ;;  %371 = vset.pattern.permute.xlu2 %v398_v3 }
   0x8   :  { %349 = vmatmul.msk.bf16.vlgmr.msra.gmra.mxu0 %vm177_vm1, %v357_v5  ;;  %109 = vperm.xlu2 %371, %v51_v9  }
   0x9   :  { %352 = vmatmul.msk.bf16.vlgmr.msra.gmra.mxu2 %vm177_vm1, %v360_v7  ;;  %355 = vmatmul.msk.bf16.vlgmr.msra.gmra.mxu3 %vm177_vm1, %v363_v8 }
   0xa   :  { %12 = vsyncpa [#allocation4], 0  ;;  %v54_v11 = vld [vmem:[%s530_s2 + $0x68] sm:$0xff]  ;;  %v52_v12 = vld [vmem:[%s530_s2 + $0x58] sm:$0xff]  ;;  %s399_s16 = smov [#allocation3]   ;;  %s308_s20 = sshll.u32 %s533_s5, 4  ;;  %s309_s20 = int_to_ptr.hbm [resolvable:$true] %s308_s20 }
   0xb   :  { %v49_v13 = vld [vmem:[%s530_s2 + $0x40] sm:$0xff]  ;;  %v358_v14 = vld [vmem:[%s529_s1 + $0x8] sm:$0xff]  ;;  %v364_v17 = vld [vmem:[%s529_s1 + $0x38] sm:$0xff]  ;;  %s306_s17 = sshll.u32 %s399_s16, 4  ;;  %s307_s17 = int_to_ptr.vmem [resolvable:$true] %s306_s17 }
   0xc   :  { %v50_v15 = vld [vmem:[%s530_s2 + $0x48] sm:$0xff]  ;;  %v361_v16 = vld [vmem:[%s529_s1 + $0x20] sm:$0xff]  ;;  %v47_v18 = vld [vmem:[%s530_s2 + $0x30] sm:$0xff] }
   0xd   :  { %134 = vperm.xlu0 %369, %v56_v10   ;;  %v48_v19 = vld [vmem:[%s530_s2 + $0x38] sm:$0xff]  ;;  %v45_v20 = vld [vmem:[%s530_s2 + $0x20] sm:$0xff]  ;;  %v46_v21 = vld [vmem:[%s530_s2 + $0x28] sm:$0xff] }
   0xe   :  { %v43_v22 = vld [vmem:[%s530_s2 + $0x10] sm:$0xff]  ;;  %v44_v24 = vld [vmem:[%s530_s2 + $0x18] sm:$0xff]  ;;  %v362_v25 = vld [vmem:[%s529_s1 + $0x28] sm:$0xff] }
   0xf   :  { %124 = vperm.xlu1 %370, %v54_v11   ;;  %v359_v23 = vld [vmem:[%s529_s1 + $0x10] sm:$0xff]  ;;  %v41_v26 = vld [vmem:[%s530_s2] sm:$0xff]  ;;  %v42_v27 = vld [vmem:[%s530_s2 + $0x8] sm:$0xff] }
  0x10   :  { %114 = vperm.xlu2 %371, %v52_v12   ;;  %v280_v28 = vld [vmem:[#allocation2] sm:$0x1] }
  0x15   :  { %99 = vperm.xlu0 %369, %v49_v13  }
  0x17   :  { %104 = vperm.xlu1 %370, %v50_v15  }
  0x18   :  { %350 = vmatmul.msk.bf16.gmra.mxu0 %vm177_vm1, %v358_v14  ;;  %89 = vperm.xlu2 %371, %v47_v18  }
  0x19   :  { %353 = vmatmul.msk.bf16.gmra.mxu2 %vm177_vm1, %v361_v16  ;;  %356 = vmatmul.msk.bf16.gmra.mxu3 %vm177_vm1, %v364_v17 }
  0x1d   :  { %94 = vperm.xlu0 %369, %v48_v19  }
  0x1f   :  { %79 = vperm.xlu1 %370, %v45_v20  }
  0x20   :  { %84 = vperm.xlu2 %371, %v46_v21  }
  0x25   :  { %69 = vperm.xlu0 %369, %v43_v22  }
  0x27   :  { %74 = vperm.xlu1 %370, %v44_v24  }
  0x28   :  { %351 = vmatmul.msk.bf16.gmra.mxu0 %vm177_vm1, %v359_v23  ;;  %59 = vperm.xlu2 %371, %v41_v26  }
  0x29   :  { %354 = vmatmul.msk.bf16.gmra.mxu2 %vm177_vm1, %v362_v25 }
  0x2d   :  { %64 = vperm.xlu0 %369, %v42_v27  }
  0x2f   :  { %283 = vperm.xlu1 %370, %v280_v28  }
  0x62   :  { %v110_v38 = vpop.permute.xlu2 %109 }
  0x6a   :  { %v115_v50 = vpop.permute.xlu2 %114 }
  0x72   :  { %v90_v61 = vpop.permute.xlu2 %89 }
  0x77   :  { %v130_v32 = vpop.permute.xlu0 %129 }
  0x79   :  { %v120_v36 = vpop.permute.xlu1 %119 }
  0x7a   :  { %v85_v11 = vpop.permute.xlu2 %84 }
  0x7f   :  { %v135_v37 = vpop.permute.xlu0 %134 }
  0x81   :  { %v125_v42 = vpop.permute.xlu1 %124 }
  0x82   :  { %v60_v27 = vpop.permute.xlu2 %59 }
  0x85   :  { %v516_v29 = vpop.f32.mrf.mxu0 }
  0x87   :  { %v100_v43 = vpop.permute.xlu0 %99 }
  0x89   :  { %v105_v57 = vpop.permute.xlu1 %104 }
  0x8c   :  { %v230_v30 = vpop.f32.mrf.mxu2  ;;  %v245_v31 = vpop.f32.mrf.mxu3 }
  0x8d   :  { %v518_v33 = vpop.f32.mrf.mxu0  ;;  %v246_v47 = vadd.f32 %v245_v31, %v120_v36  ;;  %v231_v13 = vadd.f32 %v230_v30, %v90_v61 }
  0x8f   :  { %v267_v54 = vmax.f32 %v246_v47, 0.0  ;;  %v95_v60 = vpop.permute.xlu0 %94  ;;  %v261_v18 = vmax.f32 %v231_v13, 0.0 }
  0x91   :  { %v80_v3 = vpop.permute.xlu1 %79 }
  0x94   :  { %v232_v34 = vpop.f32.mrf.mxu2  ;;  %v247_v35 = vpop.f32.mrf.mxu3 }
  0x95   :  { %v220_v39 = vpop.f32.mrf.mxu0  ;;  %v248_v48 = vadd.f32 %v247_v35, %v125_v42  ;;  %v233_v8 = vadd.f32 %v232_v34, %v95_v60  ;;  %v216_v34 = vadd.f32 %v516_v29, %v60_v27 }
  0x97   :  { %v268_v55 = vmax.f32 %v248_v48, 0.0  ;;  %v70_v7 = vpop.permute.xlu0 %69  ;;  %v262_v15 = vmax.f32 %v233_v8, 0.0 }
  0x98   :  { %v221_v21 = vadd.f32 %v220_v39, %v70_v7  ;;  %v271_v39 = vld [vmem:[%s531_s3] sm:$0x1] }
  0x99   :  { %v278_v59 = vpack.c.bf16 %v268_v55, %v267_v54  ;;  %v75_v20 = vpop.permute.xlu1 %74  ;;  %v275_v24 = vpack.c.bf16 %v262_v15, %v261_v18 }
  0x9a   :  { %v257_v28 = vmax.f32 %v221_v21, 0.0 }
  0x9c   :  { %v235_v40 = vpop.f32.mrf.mxu2  ;;  %v250_v41 = vpop.f32.mrf.mxu3 }
  0x9d   :  { %v251_v44 = vadd.f32 %v250_v41, %v130_v32  ;;  %v222_v51 = vpop.f32.mrf.mxu0  ;;  %v236_v4 = vadd.f32 %v235_v40, %v100_v43 }
  0x9e   :  { %v223_v22 = vadd.f32 %v222_v51, %v75_v20 }
  0x9f   :  { %v269_v52 = vmax.f32 %v251_v44, 0.0  ;;  %v263_v14 = vmax.f32 %v236_v4, 0.0  ;;  %v65_v25 = vpop.permute.xlu0 %64 }
  0xa0   :  { %v258_v31 = vmax.f32 %v223_v22, 0.0  ;;  %v218_v30 = vadd.f32 %v518_v33, %v65_v25 }
  0xa1   :  { %v284_v40 = vpop.permute.xlu1 %283 }
  0xa2   :  { %v256_v35 = vmax.f32 %v218_v30, 0.0  ;;  %v273_v36 = vpack.c.bf16 %v258_v31, %v257_v28  ;;  %v286_v29 = vperm.slane %v284_v40, 0 }
  0xa4   :  { %v237_v45 = vpop.f32.mrf.mxu2  ;;  %v252_v46 = vpop.f32.mrf.mxu3 }
  0xa5   :  { %v253_v49 = vadd.f32 %v252_v46, %v135_v37  ;;  %v225_v62 = vpop.f32.mrf.mxu0  ;;  %v238_v1 = vadd.f32 %v237_v45, %v105_v57  ;;  %v255_v37 = vmax.f32 %v216_v34, 0.0 }
  0xa6   :  { %v226_v19 = vadd.f32 %v225_v62, %v80_v3 }
  0xa7   :  { %v270_v53 = vmax.f32 %v253_v49, 0.0  ;;  %v264_v9 = vmax.f32 %v238_v1, 0.0 }
  0xa8   :  { %v259_v26 = vmax.f32 %v226_v19, 0.0 }
  0xa9   :  { %v279_v56 = vpack.c.bf16 %v270_v53, %v269_v52  ;;  %v276_v17 = vpack.c.bf16 %v264_v9, %v263_v14 }
  0xab   :  { %287 = vmatpush.bf16.msra.mxu1 %v279_v56 }
  0xac   :  { %v240_v58 = vpop.f32.mrf.mxu2 }
  0xad   :  { %v241_v63 = vadd.f32 %v240_v58, %v110_v38  ;;  %v227_v12 = vpop.f32.mrf.mxu0  ;;  %v272_v38 = vpack.c.bf16 %v256_v35, %v255_v37 }
  0xae   :  { %v228_v16 = vadd.f32 %v227_v12, %v85_v11 }
  0xaf   :  { %288 = vmatpush.bf16.msra.mxu1 %v278_v59  ;;  %v265_v5 = vmax.f32 %v241_v63, 0.0 }
  0xb0   :  { %v260_v23 = vmax.f32 %v228_v16, 0.0 }
  0xb2   :  { %v274_v32 = vpack.c.bf16 %v260_v23, %v259_v26 }
  0xb4   :  { %v242_v0 = vpop.f32.mrf.mxu2 }
  0xb5   :  { %v243_v2 = vadd.f32 %v242_v0, %v115_v50 }
  0xb7   :  { %v266_v6 = vmax.f32 %v243_v2, 0.0 }
  0xb9   :  { %v277_v10 = vpack.c.bf16 %v266_v6, %v265_v5 }
  0xbb   :  { %289 = vmatpush.bf16.msra.mxu1 %v277_v10 }
  0xbf   :  { %290 = vmatpush.bf16.msra.mxu1 %v276_v17 }
  0xc3   :  { %291 = vmatpush.bf16.msra.mxu1 %v275_v24 }
  0xc7   :  { %292 = vmatpush.bf16.msra.mxu1 %v274_v32 }
  0xcb   :  { %293 = vmatpush.bf16.msra.mxu1 %v273_v36 }
  0xcf   :  { %294 = vmatpush.bf16.msra.mxu1 %v272_v38 }
  0xd2   :  { %295 = vmatmul.bf16.vlgmr.msra.gmra.mxu1 %v271_v39 }
 0x14f   :  { %v296_v33 = vpop.f32.mrf.mxu1 }
 0x150   :  { %v297_v41 = vadd.f32 %v296_v33, %v286_v29 }
 0x152   :  { %300 = vst [vmem:[#allocation3] sm:$0x1] %v297_v41 }
 0x153   :  { %311 = dma.vmem_to_hbm [thread:$0]  %s307_s17, 16, %s309_s20, [#allocation4]  }
 0x157   :  { %v298_v42 = vpop.f32.mrf.mxu1 }
 0x158   :  { %396 = dma.done.wait [#allocation4], 16  }
 0x159   :  { %397 = vsyncadd [#allocation4], 4294967280 }
 0x15a   :  { %316 = vsyncpa [#allocation4], 1 }

</bundles_post_ra>
